<compile_context>
chip_gen: v5e
topology: v5e:2x2
jax: 0.10.0
libtpu: 0.0.40
codegen_flags: <defaults>
</compile_context>

<pallas_src>
import functools
import math

import jax
import jax.numpy as jnp
from jax.experimental import pallas as pl
from jax.experimental.pallas import tpu as pltpu


def _round_up(n, m):
    return ((n + m - 1) // m) * m


def _cdiv(a, b):
    return -(-a // b)


def _mdn_kernel(x_ref, w1_ref, b1_ref, w2_ref, b2_ref, w3_ref, b3_ref, out_ref,
                *, num_gaussians, gd):
    """Fused 3-head MLP: (TB, in) x-tile -> one lane-dense (TB, 128) output slab."""
    x = x_ref[...]                                                    # bf16

    # Three heads fused: W2 / W3 are block-diagonal, so one matmul per layer.
    # bf16 operands on the MXU, f32 accumulation; bias/ReLU in f32 (VPU).
    h = jnp.dot(x, w1_ref[...], preferred_element_type=jnp.float32) + b1_ref[...]
    h = jnp.maximum(h, 0.0)
    h = jnp.dot(h.astype(jnp.bfloat16), w2_ref[...],
                preferred_element_type=jnp.float32) + b2_ref[...]
    h = jnp.maximum(h, 0.0)
    o = jnp.dot(h.astype(jnp.bfloat16), w3_ref[...],
                preferred_element_type=jnp.float32) + b3_ref[...]

    g = num_gaussians
    col = jax.lax.broadcasted_iota(jnp.int32, o.shape, 1)
    is_pi = col < g
    is_mu = jnp.logical_and(col >= g, col < g + gd)

    # Softmax max over the pi lanes only.
    m = jnp.max(jnp.where(is_pi, o, -1e30), axis=-1, keepdims=True)

    # ONE exp over the whole slab:
    #   pi lanes    -> exp(o - m)   (softmax numerator)
    #   mu lanes    -> exp(0) = 1   (discarded; avoids overflow on raw mu)
    #   sigma lanes -> exp(o)       (sigma head)
    #   pad lanes   -> exp(0) = 1   (discarded)
    shift = jnp.where(is_pi, m, jnp.where(is_mu, o, 0.0))
    e_all = jnp.exp(o - shift)

    num = jnp.where(is_pi, e_all, 0.0)
    denom = jnp.sum(num, axis=-1, keepdims=True)
    pi_vals = num / denom + 0.0001          # exact division (bit-parity w/ ref)

    # Single unmasked 128-lane store: [pi (g) | mu (gd) | sigma (gd) | zero pad].
    out_ref[...] = jnp.where(
        is_pi, pi_vals,
        jnp.where(is_mu, o,
                  jnp.where(col < g + 2 * gd, e_all + 0.0001, 0.0)))


def mixture_density_mlp_forward(x, params, *, num_gaussians, output_dim, hidden,
                                block_b=1024):
    """x: (B, input_dim) float32.  params: dict of per-head (in, out) weights."""
    B, input_dim = x.shape
    G, D = num_gaussians, output_dim
    GD = G * D
    out_width = G + 2 * GD
    h3 = 3 * hidden
    HP = _round_up(h3, 128)              # fused hidden width, padded to full lanes
    OUT_PAD = _round_up(out_width, 128)  # lane-dense output slab width

    # ---- host-side fusion of the three heads: [pi | mu | sigma] ----
    w1 = jnp.concatenate([params["pi_w1"], params["mu_w1"], params["sigma_w1"]], axis=1)
    b1 = jnp.concatenate([params["pi_b1"], params["mu_b1"], params["sigma_b1"]], axis=1)
    w2 = jax.scipy.linalg.block_diag(params["pi_w2"], params["mu_w2"], params["sigma_w2"])
    b2 = jnp.concatenate([params["pi_b2"], params["mu_b2"], params["sigma_b2"]], axis=1)
    w3 = jax.scipy.linalg.block_diag(params["pi_w3"], params["mu_w3"], params["sigma_w3"])
    b3 = jnp.concatenate([params["pi_b3"], params["mu_b3"], params["sigma_b3"]], axis=1)

    # ---- pad fused hidden/output widths to 128-lane multiples; weights -> bf16 ----
    w1p = jnp.zeros((input_dim, HP), jnp.float32).at[:, :h3].set(w1).astype(jnp.bfloat16)
    b1p = jnp.zeros((1, HP), jnp.float32).at[:, :h3].set(b1)
    w2p = jnp.zeros((HP, HP), jnp.float32).at[:h3, :h3].set(w2).astype(jnp.bfloat16)
    b2p = jnp.zeros((1, HP), jnp.float32).at[:, :h3].set(b2)
    w3p = jnp.zeros((HP, OUT_PAD), jnp.float32).at[:h3, :out_width].set(w3).astype(jnp.bfloat16)
    b3p = jnp.zeros((1, OUT_PAD), jnp.float32).at[:, :out_width].set(b3)

    # ---- batch tiling: balanced tiles, >=2 grid steps for v7x megacore ----
    n_tiles = _cdiv(B, block_b)
    if n_tiles < 2 and B > 8:
        n_tiles = 2                       # let both v7x TensorCores get a tile
    TB = _round_up(_cdiv(B, n_tiles), 8)  # balanced -> avoids ~2x padding corner
    Bp = _round_up(B, TB)
    xp = x.astype(jnp.bfloat16)
    if Bp != B:
        xp = jnp.pad(xp, ((0, Bp - B), (0, 0)))
    grid = (Bp // TB,)

    # Weights/biases: constant block index -> resident in VMEM, DMA'd once.
    resident = lambda shape: pl.BlockSpec(shape, lambda i: (0, 0))

    # VMEM guard (mainly v7x: 64 MiB physical / 32 MiB scoped default).
    est_vmem_bytes = (
        2 * TB * input_dim * 2                                  # x tiles (bf16, 2 bufs)
        + 2 * TB * OUT_PAD * 4                                  # out tiles (f32, 2 bufs)
        + 6 * TB * max(HP, OUT_PAD) * 4                         # f32 intermediates
        + 2 * 2 * (input_dim * HP + HP * HP + HP * OUT_PAD)     # bf16 weights
        + 2 * 4 * (2 * HP + 2 * OUT_PAD)                        # f32 biases
    )
    compiler_kwargs = dict(dimension_semantics=("parallel",))
    if est_vmem_bytes > (32 << 20):
        compiler_kwargs["vmem_limit_bytes"] = min(est_vmem_bytes + (8 << 20), 64 << 20)

    out = pl.pallas_call(
        functools.partial(_mdn_kernel, num_gaussians=G, gd=GD),
        out_shape=jax.ShapeDtypeStruct((Bp, OUT_PAD), jnp.float32),
        grid_spec=pltpu.PrefetchScalarGridSpec(
            num_scalar_prefetch=0,
            grid=grid,
            in_specs=[
                pl.BlockSpec((TB, input_dim), lambda i: (i, 0)),   # x tile (pipelined)
                resident((input_dim, HP)), resident((1, HP)),      # layer 1
                resident((HP, HP)), resident((1, HP)),             # layer 2 (block-diag)
                resident((HP, OUT_PAD)), resident((1, OUT_PAD)),   # layer 3 (block-diag)
            ],
            out_specs=pl.BlockSpec((TB, OUT_PAD), lambda i: (i, 0)),
        ),
        compiler_params=pltpu.CompilerParams(**compiler_kwargs),
    )(xp, w1p, b1p, w2p, b2p, w3p, b3p)

    # glue: one slice of the padded slab, then split heads (torch .view(-1, G, D))
    out = out[:B, :out_width]
    pi = out[:, :G]
    mu = out[:, G:G + GD].reshape(B, G, D)
    sigma = out[:, G + GD:].reshape(B, G, D)
    return pi, mu, sigma


def init_params(key, input_dim, hidden, output_dim, num_gaussians):
    """Deterministic PyTorch-style uniform init; weights stored as (in, out)."""
    params = {}
    head_out = {"pi": num_gaussians, "mu": output_dim * num_gaussians,
                "sigma": output_dim * num_gaussians}
    layer_dims = lambda out_dim: [(input_dim, hidden), (hidden, hidden), (hidden, out_dim)]

    for head in ("pi", "mu", "sigma"):
        for li, (fan_in, fan_out) in enumerate(layer_dims(head_out[head]), start=1):
            key, kw, kb = jax.random.split(key, 3)
            bound = 1.0 / math.sqrt(fan_in)
            params[f"{head}_w{li}"] = jax.random.uniform(
                kw, (fan_in, fan_out), jnp.float32, -bound, bound)
            params[f"{head}_b{li}"] = jax.random.uniform(
                kb, (1, fan_out), jnp.float32, -bound, bound)
    return params


def _reference_forward(x, params, *, num_gaussians, output_dim,
                       matmul_dtype=jnp.float32):
    """Pure-JAX reference mirroring the PyTorch forward.

    matmul_dtype=jnp.bfloat16 mirrors the kernel's MXU operand precision
    (f32 accumulation) for a tight apples-to-apples check."""
    def mm(a, w):
        return jnp.dot(a.astype(matmul_dtype), w.astype(matmul_dtype),
                       preferred_element_type=jnp.float32)

    def branch(head):
        h = jnp.maximum(mm(x, params[f"{head}_w1"]) + params[f"{head}_b1"], 0.0)
        h = jnp.maximum(mm(h, params[f"{head}_w2"]) + params[f"{head}_b2"], 0.0)
        return mm(h, params[f"{head}_w3"]) + params[f"{head}_b3"]

    pi = jax.nn.softmax(branch("pi"), axis=1) + 0.0001
    mu = branch("mu").reshape(-1, num_gaussians, output_dim)
    sigma = jnp.exp(branch("sigma")).reshape(-1, num_gaussians, output_dim) + 0.0001
    return pi, mu, sigma


if __name__ == "__main__":
    B, INPUT_DIM, HIDDEN, OUTPUT_DIM, NUM_GAUSSIANS = 8, 32, 16, 2, 2

    key = jax.random.PRNGKey(0)
    key, kx = jax.random.split(key)
    x = jax.random.normal(kx, (B, INPUT_DIM), dtype=jnp.float32)
    params = init_params(key, INPUT_DIM, HIDDEN, OUTPUT_DIM, NUM_GAUSSIANS)

    pi, mu, sigma = mixture_density_mlp_forward(
        x, params, num_gaussians=NUM_GAUSSIANS, output_dim=OUTPUT_DIM, hidden=HIDDEN)
    jax.block_until_ready((pi, mu, sigma))

    assert pi.shape == (B, NUM_GAUSSIANS)
    assert mu.shape == (B, NUM_GAUSSIANS, OUTPUT_DIM)
    assert sigma.shape == (B, NUM_GAUSSIANS, OUTPUT_DIM)

    # Primary check: reference with identical bf16 matmul operands (tight tolerance).
    pi_r, mu_r, sigma_r = _reference_forward(
        x, params, num_gaussians=NUM_GAUSSIANS, output_dim=OUTPUT_DIM,
        matmul_dtype=jnp.bfloat16)
    assert jnp.allclose(pi, pi_r, atol=2e-3), float(jnp.max(jnp.abs(pi - pi_r)))
    assert jnp.allclose(mu, mu_r, atol=2e-3), float(jnp.max(jnp.abs(mu - mu_r)))
    assert jnp.allclose(sigma, sigma_r, rtol=2e-3, atol=2e-3), (
        float(jnp.max(jnp.abs(sigma - sigma_r))))

    # Sanity check vs full-f32 reference (loose; bf16 MXU operands perturb slightly).
    pi_f, mu_f, sigma_f = _reference_forward(
        x, params, num_gaussians=NUM_GAUSSIANS, output_dim=OUTPUT_DIM,
        matmul_dtype=jnp.float32)
    assert jnp.allclose(pi, pi_f, atol=5e-2), float(jnp.max(jnp.abs(pi - pi_f)))
    assert jnp.allclose(mu, mu_f, atol=1e-1), float(jnp.max(jnp.abs(mu - mu_f)))
    assert jnp.allclose(sigma, sigma_f, rtol=1e-1, atol=1e-1), (
        float(jnp.max(jnp.abs(sigma - sigma_f))))

    print("KERNEL_OK")
</pallas_src>

<mosaic_0001>
module attributes {stable_mosaic.version = 11 : i64} {
  func.func @_mdn_kernel(%arg0: i32, %arg1: memref<8x32xbf16, #tpu.memory_space<vmem>>, %arg2: memref<32x128xbf16, #tpu.memory_space<vmem>>, %arg3: memref<1x128xf32, #tpu.memory_space<vmem>>, %arg4: memref<128x128xbf16, #tpu.memory_space<vmem>>, %arg5: memref<1x128xf32, #tpu.memory_space<vmem>>, %arg6: memref<128x128xbf16, #tpu.memory_space<vmem>>, %arg7: memref<1x128xf32, #tpu.memory_space<vmem>>, %arg8: memref<8x128xf32, #tpu.memory_space<vmem>>) attributes {dimension_semantics = [#tpu.dimension_semantics<parallel>], iteration_bounds = array<i64: 1>, scalar_prefetch = 0 : i64, scratch_operands = 0 : i64, tpu.core_type = #tpu.core_type<tc>, window_params = [{transform_indices = @transform_0, window_bounds = array<i64: 8, 32>}, {pipeline_mode = #tpu.pipeline_mode<synchronous>, transform_indices = @transform_1, window_bounds = array<i64: 32, 128>}, {pipeline_mode = #tpu.pipeline_mode<synchronous>, transform_indices = @transform_2, window_bounds = array<i64: 1, 128>}, {pipeline_mode = #tpu.pipeline_mode<synchronous>, transform_indices = @transform_3, window_bounds = array<i64: 128, 128>}, {pipeline_mode = #tpu.pipeline_mode<synchronous>, transform_indices = @transform_4, window_bounds = array<i64: 1, 128>}, {pipeline_mode = #tpu.pipeline_mode<synchronous>, transform_indices = @transform_5, window_bounds = array<i64: 128, 128>}, {pipeline_mode = #tpu.pipeline_mode<synchronous>, transform_indices = @transform_6, window_bounds = array<i64: 1, 128>}, {transform_indices = @transform_7, window_bounds = array<i64: 8, 128>}]} {
    %c0 = arith.constant 0 : index
    %c0_0 = arith.constant 0 : index
    %0 = vector.load %arg1[%c0, %c0_0] : memref<8x32xbf16, #tpu.memory_space<vmem>>, vector<8x32xbf16>
    %c0_1 = arith.constant 0 : index
    %c0_2 = arith.constant 0 : index
    %1 = vector.load %arg2[%c0_1, %c0_2] : memref<32x128xbf16, #tpu.memory_space<vmem>>, vector<32x128xbf16>
    %cst = arith.constant dense<0.000000e+00> : vector<8x128xf32>
    %2 = tpu.matmul %0, %1, %cst {dimension_numbers = #tpu.dot_dimension_numbers<[1], [0], [0], [1], [0, 0, 1, 1], [], []>} : vector<8x32xbf16>, vector<32x128xbf16>, vector<8x128xf32> -> vector<8x128xf32>
    %c0_3 = arith.constant 0 : index
    %c0_4 = arith.constant 0 : index
    %3 = vector.load %arg3[%c0_3, %c0_4] : memref<1x128xf32, #tpu.memory_space<vmem>>, vector<1x128xf32>
    %4 = vector.broadcast %3 : vector<1x128xf32> to vector<8x128xf32>
    %5 = arith.addf %2, %4 : vector<8x128xf32>
    %cst_5 = arith.constant 0.000000e+00 : f32
    %6 = vector.broadcast %cst_5 : f32 to vector<8x128xf32>
    %7 = arith.maximumf %5, %6 : vector<8x128xf32>
    %8 = arith.truncf %7 : vector<8x128xf32> to vector<8x128xbf16>
    %c0_6 = arith.constant 0 : index
    %c0_7 = arith.constant 0 : index
    %9 = vector.load %arg4[%c0_6, %c0_7] : memref<128x128xbf16, #tpu.memory_space<vmem>>, vector<128x128xbf16>
    %cst_8 = arith.constant dense<0.000000e+00> : vector<8x128xf32>
    %10 = tpu.matmul %8, %9, %cst_8 {dimension_numbers = #tpu.dot_dimension_numbers<[1], [0], [0], [1], [0, 0, 1, 1], [], []>} : vector<8x128xbf16>, vector<128x128xbf16>, vector<8x128xf32> -> vector<8x128xf32>
    %c0_9 = arith.constant 0 : index
    %c0_10 = arith.constant 0 : index
    %11 = vector.load %arg5[%c0_9, %c0_10] : memref<1x128xf32, #tpu.memory_space<vmem>>, vector<1x128xf32>
    %12 = vector.broadcast %11 : vector<1x128xf32> to vector<8x128xf32>
    %13 = arith.addf %10, %12 : vector<8x128xf32>
    %cst_11 = arith.constant 0.000000e+00 : f32
    %14 = vector.broadcast %cst_11 : f32 to vector<8x128xf32>
    %15 = arith.maximumf %13, %14 : vector<8x128xf32>
    %16 = arith.truncf %15 : vector<8x128xf32> to vector<8x128xbf16>
    %c0_12 = arith.constant 0 : index
    %c0_13 = arith.constant 0 : index
    %17 = vector.load %arg6[%c0_12, %c0_13] : memref<128x128xbf16, #tpu.memory_space<vmem>>, vector<128x128xbf16>
    %cst_14 = arith.constant dense<0.000000e+00> : vector<8x128xf32>
    %18 = tpu.matmul %16, %17, %cst_14 {dimension_numbers = #tpu.dot_dimension_numbers<[1], [0], [0], [1], [0, 0, 1, 1], [], []>} : vector<8x128xbf16>, vector<128x128xbf16>, vector<8x128xf32> -> vector<8x128xf32>
    %c0_15 = arith.constant 0 : index
    %c0_16 = arith.constant 0 : index
    %19 = vector.load %arg7[%c0_15, %c0_16] : memref<1x128xf32, #tpu.memory_space<vmem>>, vector<1x128xf32>
    %20 = vector.broadcast %19 : vector<1x128xf32> to vector<8x128xf32>
    %21 = arith.addf %18, %20 : vector<8x128xf32>
    %22 = tpu.iota {dimensions = array<i32: 1>} : vector<8x128xi32>
    %c2_i32 = arith.constant 2 : i32
    %23 = vector.broadcast %c2_i32 : i32 to vector<8x128xi32>
    %24 = arith.cmpi slt, %22, %23 : vector<8x128xi32>
    %c2_i32_17 = arith.constant 2 : i32
    %25 = vector.broadcast %c2_i32_17 : i32 to vector<8x128xi32>
    %26 = arith.cmpi sge, %22, %25 : vector<8x128xi32>
    %c6_i32 = arith.constant 6 : i32
    %27 = vector.broadcast %c6_i32 : i32 to vector<8x128xi32>
    %28 = arith.cmpi slt, %22, %27 : vector<8x128xi32>
    %29 = arith.andi %26, %28 : vector<8x128xi1>
    %cst_18 = arith.constant -1.000000e+30 : f32
    %30 = vector.broadcast %cst_18 : f32 to vector<8x128xf32>
    %31 = arith.select %24, %21, %30 : vector<8x128xi1>, vector<8x128xf32>
    %cst_19 = arith.constant dense<0xFF800000> : vector<8xf32>
    %32 = vector.multi_reduction <maximumf>, %31, %cst_19 [1] : vector<8x128xf32> to vector<8xf32>
    %33 = vector.shape_cast %32 : vector<8xf32> to vector<8x1xf32>
    %cst_20 = arith.constant 0.000000e+00 : f32
    %34 = vector.broadcast %cst_20 : f32 to vector<8x128xf32>
    %35 = arith.select %29, %21, %34 : vector<8x128xi1>, vector<8x128xf32>
    %36 = vector.shape_cast %33 : vector<8x1xf32> to vector<8x1xf32>
    %37 = vector.broadcast %36 : vector<8x1xf32> to vector<8x128xf32>
    %38 = arith.select %24, %37, %35 : vector<8x128xi1>, vector<8x128xf32>
    %39 = arith.subf %21, %38 : vector<8x128xf32>
    %40 = math.exp %39 : vector<8x128xf32>
    %cst_21 = arith.constant 0.000000e+00 : f32
    %41 = vector.broadcast %cst_21 : f32 to vector<8x128xf32>
    %42 = arith.select %24, %40, %41 : vector<8x128xi1>, vector<8x128xf32>
    %cst_22 = arith.constant dense<0.000000e+00> : vector<8xf32>
    %43 = vector.multi_reduction <add>, %42, %cst_22 [1] : vector<8x128xf32> to vector<8xf32>
    %44 = vector.shape_cast %43 : vector<8xf32> to vector<8x1xf32>
    %45 = vector.broadcast %44 : vector<8x1xf32> to vector<8x128xf32>
    %46 = arith.divf %42, %45 : vector<8x128xf32>
    %cst_23 = arith.constant 9.99999974E-5 : f32
    %47 = vector.broadcast %cst_23 : f32 to vector<8x128xf32>
    %48 = arith.addf %46, %47 : vector<8x128xf32>
    %c10_i32 = arith.constant 10 : i32
    %49 = vector.broadcast %c10_i32 : i32 to vector<8x128xi32>
    %50 = arith.cmpi slt, %22, %49 : vector<8x128xi32>
    %cst_24 = arith.constant 9.99999974E-5 : f32
    %51 = vector.broadcast %cst_24 : f32 to vector<8x128xf32>
    %52 = arith.addf %40, %51 : vector<8x128xf32>
    %cst_25 = arith.constant 0.000000e+00 : f32
    %53 = vector.broadcast %cst_25 : f32 to vector<8x128xf32>
    %54 = arith.select %50, %52, %53 : vector<8x128xi1>, vector<8x128xf32>
    %55 = arith.select %29, %21, %54 : vector<8x128xi1>, vector<8x128xf32>
    %56 = arith.select %24, %48, %55 : vector<8x128xi1>, vector<8x128xf32>
    %c0_26 = arith.constant 0 : index
    %c0_27 = arith.constant 0 : index
    %57 = vector.load %arg8[%c0_26, %c0_27] : memref<8x128xf32, #tpu.memory_space<vmem>>, vector<8x128xf32>
    tpu.vector_store %arg8[%c0_26, %c0_27], %56 {strides = array<i32>} : memref<8x128xf32, #tpu.memory_space<vmem>>, vector<8x128xf32>,
    return
  }
  func.func @transform_0(%arg0: i32) -> (i32, i32) {
    %c0_i32 = arith.constant 0 : i32
    %c0_i32_0 = arith.constant 0 : i32
    return %arg0, %c0_i32 : i32, i32
  }
  func.func @transform_1(%arg0: i32) -> (i32, i32) {
    %c0_i32 = arith.constant 0 : i32
    %c0_i32_0 = arith.constant 0 : i32
    %c0_i32_1 = arith.constant 0 : i32
    return %c0_i32, %c0_i32_0 : i32, i32
  }
  func.func @transform_2(%arg0: i32) -> (i32, i32) {
    %c0_i32 = arith.constant 0 : i32
    %c0_i32_0 = arith.constant 0 : i32
    %c0_i32_1 = arith.constant 0 : i32
    return %c0_i32, %c0_i32_0 : i32, i32
  }
  func.func @transform_3(%arg0: i32) -> (i32, i32) {
    %c0_i32 = arith.constant 0 : i32
    %c0_i32_0 = arith.constant 0 : i32
    %c0_i32_1 = arith.constant 0 : i32
    return %c0_i32, %c0_i32_0 : i32, i32
  }
  func.func @transform_4(%arg0: i32) -> (i32, i32) {
    %c0_i32 = arith.constant 0 : i32
    %c0_i32_0 = arith.constant 0 : i32
    %c0_i32_1 = arith.constant 0 : i32
    return %c0_i32, %c0_i32_0 : i32, i32
  }
  func.func @transform_5(%arg0: i32) -> (i32, i32) {
    %c0_i32 = arith.constant 0 : i32
    %c0_i32_0 = arith.constant 0 : i32
    %c0_i32_1 = arith.constant 0 : i32
    return %c0_i32, %c0_i32_0 : i32, i32
  }
  func.func @transform_6(%arg0: i32) -> (i32, i32) {
    %c0_i32 = arith.constant 0 : i32
    %c0_i32_0 = arith.constant 0 : i32
    %c0_i32_1 = arith.constant 0 : i32
    return %c0_i32, %c0_i32_0 : i32, i32
  }
  func.func @transform_7(%arg0: i32) -> (i32, i32) {
    %c0_i32 = arith.constant 0 : i32
    %c0_i32_0 = arith.constant 0 : i32
    return %arg0, %c0_i32 : i32, i32
  }
}

</mosaic_0001>

<bundles_post_ra>
// kernel: tpu_custom_call.1
= control target key start
LH: loop header
LB: loop body
LE: loop exit
PB: predicated region body
PF: predicated region fallthrough
CT: control target
= control target key end

     0   :  { %12 = vsyncpa [#allocation3], 0  ;;  %s667_s0 = inlined_call_operand.hbm [shape: bf16[8,32], index: 0, kind: input, shape index: {}]   ;;  %s668_s1 = inlined_call_operand.hbm [shape: bf16[32,128], index: 1, kind: input, shape index: {}]   ;;  %s669_s2 = inlined_call_operand.vmem [shape: f32[1,128], index: 2, kind: input, shape index: {}]   ;;  %s670_s3 = inlined_call_operand.hbm [shape: bf16[128,128], index: 3, kind: input, shape index: {}]   ;;  %s671_s4 = inlined_call_operand.vmem [shape: f32[1,128], index: 4, kind: input, shape index: {}]   ;;  %s672_s5 = inlined_call_operand.hbm [shape: bf16[128,128], index: 5, kind: input, shape index: {}]   ;;  %s673_s6 = inlined_call_operand.vmem [shape: f32[1,128], index: 6, kind: input, shape index: {}]   ;;  %s674_s7 = inlined_call_operand.hbm [shape: f32[8,128], index: 7, kind: output, shape index: {}]  }
   0x1   :  { %13 = vsyncpa [#allocation6], 0 }
   0x2   :  { %14 = vsyncpa [#allocation9], 0  ;;  %s31_s26 = sshll.u32 %s668_s1, 4  ;;  %s32_s26 = int_to_ptr.hbm [resolvable:$true] %s31_s26 }
   0x3   :  { %15 = vsyncpa [#allocation4], 0  ;;  %s584_s27 = smov [#allocation5]   ;;  %s21_s8 = sshll.u32 %s667_s0, 4  ;;  %s22_s8 = int_to_ptr.hbm [resolvable:$true] %s21_s8 }
   0x4   :  { %s33_s28 = sshll.u32 %s584_s27, 4  ;;  %s585_s9 = smov 64   ;;  %s34_s28 = int_to_ptr.vmem [resolvable:$true] %s33_s28 }
   0x5   :  { %s586_s10 = smov 4   ;;  %s587_s11 = smov [#allocation2]  }
   0x6   :  { %39 = dma.hbm_to_vmem [thread:$0]  %s32_s26, 256, %s34_s28, [#allocation6], %s585_s9, %s585_s9, %s586_s10  }
   0x7   :  { %s23_s12 = sshll.u32 %s587_s11, 4  ;;  %s46_s15 = sshll.u32 %s670_s3, 4  ;;  %s24_s12 = int_to_ptr.vmem [resolvable:$true] %s23_s12  ;;  %s47_s15 = int_to_ptr.hbm [resolvable:$true] %s46_s15 }
   0x8   :  { %26 = dma.hbm_to_vmem [thread:$0]  %s22_s8, 64, %s24_s12, [#allocation3]  }
   0x9   :  { %s61_s17 = sshll.u32 %s672_s5, 4  ;;  %s588_s18 = smov [#allocation7]   ;;  %s62_s17 = int_to_ptr.hbm [resolvable:$true] %s61_s17 }
   0xa   :  { %s48_s19 = sshll.u32 %s588_s18, 4  ;;  %s589_s0 = smov [#allocation8]   ;;  %s49_s19 = int_to_ptr.vmem [resolvable:$true] %s48_s19 }
   0xb   :  { %54 = dma.hbm_to_vmem [thread:$0]  %s47_s15, 1024, %s49_s19, [#allocation6], %s585_s9, %s585_s9, %s586_s10  }
   0xc   :  { %s63_s20 = sshll.u32 %s589_s0, 4  ;;  %s64_s20 = int_to_ptr.vmem [resolvable:$true] %s63_s20 }
   0xd   :  { %69 = dma.hbm_to_vmem [thread:$0]  %s62_s17, 1024, %s64_s20, [#allocation9], %s585_s9, %s585_s9, %s586_s10  }
   0xe   :  { %576 = dma.done.wait [#allocation3], 64  }
   0xf   :  { %577 = vsyncadd [#allocation3], 4294967232 }
  0x10   :  { %578 = dma.done.wait [#allocation6], 1280  }
  0x11   :  { %579 = vsyncadd [#allocation6], 4294966016 }
  0x12   :  { %580 = dma.done.wait [#allocation9], 1024  }
  0x13   :  { %581 = vsyncadd [#allocation9], 4294966272  ;;  %v425_v0 = vld [vmem:[#allocation5 + $0x8] sm:$0xff]  ;;  %v424_v2 = vld [vmem:[#allocation5] sm:$0xff]  ;;  %vm110_vm0 = vcmask 261120   ;;  %v293_v31 = vlaneseq  ;;  %s339_s26 = sshll.u32 %s674_s7, 4  ;;  %s340_s26 = int_to_ptr.hbm [resolvable:$true] %s339_s26 }
  0x14   :  { %v433_v1 = vld [vmem:[#allocation7 + $0x38] sm:$0xff]  ;;  %120 = vmatpush.bf16.msra.mxu0 %v425_v0  ;;  %v432_v3 = vld [vmem:[#allocation7 + $0x30] sm:$0xff]  ;;  %v89_v4 = vld [vmem:[#allocation2] sm:$0xf] }
  0x15   :  { %197 = vmatpush.bf16.msra.mxu1 %v433_v1  ;;  %v431_v5 = vld [vmem:[#allocation7 + $0x28] sm:$0xff]  ;;  %v430_v6 = vld [vmem:[#allocation7 + $0x20] sm:$0xff]  ;;  %v429_v7 = vld [vmem:[#allocation7 + $0x18] sm:$0xff]  ;;  %v294_v32 = vand.u32 127, %v293_v31 }
  0x16   :  { %v428_v8 = vld [vmem:[#allocation7 + $0x10] sm:$0xff]  ;;  %v427_v9 = vld [vmem:[#allocation7 + $0x8] sm:$0xff]  ;;  %v426_v10 = vld [vmem:[#allocation7] sm:$0xff] }
  0x17   :  { %v441_v11 = vld [vmem:[#allocation8 + $0x38] sm:$0xff]  ;;  %v440_v12 = vld [vmem:[#allocation8 + $0x30] sm:$0xff]  ;;  %v439_v13 = vld [vmem:[#allocation8 + $0x28] sm:$0xff]  ;;  %vm295_vm1 = vcmp.lt.s32.totalorder %v294_v32, 2  ;;  %vm296_vm2 = vcmp.ge.s32.totalorder %v294_v32, 2  ;;  %vm297_vm3 = vcmp.lt.s32.totalorder %v294_v32, 6 }
  0x18   :  { %121 = vmatpush.bf16.msra.mxu0 %v424_v2  ;;  %280 = vmatpush.bf16.msra.mxu2 %v441_v11  ;;  %v438_v14 = vld [vmem:[#allocation8 + $0x20] sm:$0xff]  ;;  %v437_v15 = vld [vmem:[#allocation8 + $0x18] sm:$0xff]  ;;  %v436_v16 = vld [vmem:[#allocation8 + $0x10] sm:$0xff]  ;;  %vm326_vm8 = vcmp.lt.s32.totalorder %v294_v32, 10 }
  0x19   :  { %198 = vmatpush.bf16.msra.mxu1 %v432_v3  ;;  %v449_v17 = vld [vmem:[%s669_s2] ss:$0 sm:$0xff]  ;;  %v434_v24 = vld [vmem:[#allocation8] sm:$0xff]  ;;  %vm653_vm4 = vmand %vm296_vm2, %vm297_vm3 }
  0x1a   :  { %v435_v23 = vld [vmem:[#allocation8 + $0x8] sm:$0xff] }
  0x1b   :  { %359 = vmatmul.msk.bf16.vlgmr.msra.gmra.mxu0 %vm110_vm0, %v89_v4  ;;  %v450_v25 = vld [vmem:[%s671_s4] ss:$0 sm:$0xff]  ;;  %s590_s4 = smov [#allocation10]  }
  0x1c   :  { %281 = vmatpush.bf16.msra.mxu2 %v440_v12  ;;  %v451_v33 = vld [vmem:[%s673_s6] ss:$0 sm:$0xff]  ;;  %s337_s6 = sshll.u32 %s590_s4, 4  ;;  %s338_s6 = int_to_ptr.vmem [resolvable:$true] %s337_s6 }
  0x1d   :  { %199 = vmatpush.bf16.msra.mxu1 %v431_v5 }
  0x20   :  { %282 = vmatpush.bf16.msra.mxu2 %v439_v13 }
  0x21   :  { %200 = vmatpush.bf16.msra.mxu1 %v430_v6 }
  0x24   :  { %283 = vmatpush.bf16.msra.mxu2 %v438_v14 }
  0x25   :  { %201 = vmatpush.bf16.msra.mxu1 %v429_v7 }
  0x28   :  { %284 = vmatpush.bf16.msra.mxu2 %v437_v15 }
  0x29   :  { %202 = vmatpush.bf16.msra.mxu1 %v428_v8 }
  0x2c   :  { %285 = vmatpush.bf16.msra.mxu2 %v436_v16 }
  0x2d   :  { %203 = vmatpush.bf16.msra.mxu1 %v427_v9 }
  0x30   :  { %286 = vmatpush.bf16.msra.mxu2 %v435_v23 }
  0x31   :  { %204 = vmatpush.bf16.msra.mxu1 %v426_v10 }
  0x34   :  { %287 = vmatpush.bf16.msra.mxu2 %v434_v24 }
  0x98   :  { %v123_v18 = vpop.f32.mrf.mxu0 }
  0x99   :  { %v124_v19 = vadd.f32 %v449_v17, %v123_v18 }
  0x9b   :  { %v127_v20 = vmax.f32 %v124_v19, 0.0 }
  0x9d   :  { %v128_v21 = vpack.c.bf16 %v127_v20, %v127_v20 }
  0x9f   :  { %205 = vmatmul.bf16.vlgmr.msra.gmra.mxu1 %v128_v21 }
  0xa0   :  { %v125_v22 = vpop.f32.mrf.mxu0 }
 0x11c   :  { %v206_v26 = vpop.f32.mrf.mxu1 }
 0x11d   :  { %v207_v27 = vadd.f32 %v450_v25, %v206_v26 }
 0x11f   :  { %v210_v28 = vmax.f32 %v207_v27, 0.0 }
 0x121   :  { %v211_v29 = vpack.c.bf16 %v210_v28, %v210_v28 }
 0x123   :  { %288 = vmatmul.bf16.vlgmr.msra.gmra.mxu2 %v211_v29 }
 0x124   :  { %v208_v30 = vpop.f32.mrf.mxu1 }
 0x1a6   :  { %v289_v34 = vpop.f32.mrf.mxu2 }
 0x1a7   :  { %v290_v35 = vadd.f32 %v451_v33, %v289_v34 }
 0x1a9   :  { %v299_v36 = vsel %vm295_vm1, %v290_v35, -1e+30  ;;  %v302_v39 = vsel %vm653_vm4, %v290_v35, 0.0 }
 0x1aa   :  { %300 = vmax.xlane.f32.xlu0 %v299_v36 }
 0x1ae   :  { %v291_v37 = vpop.f32.mrf.mxu2 }
 0x21d   :  { %v301_v40 = vpop.xlane.xlu0 %300 }
 0x21e   :  { %v303_v41 = vsel %vm295_vm1, %v301_v40, %v302_v39 }
 0x21f   :  { %v304_v42 = vsub.f32 %v290_v35, %v303_v41 }
 0x221   :  { %v305_v43 = vmul.f32 1.442695, %v304_v42 }
 0x223   :  { %452 = vpow2.f32 %v305_v43 }
 0x229   :  { %v453_v44 = vpop.eup %452 }
 0x22a   :  { %v307_v45 = vsel %vm295_vm1, %v453_v44, 0.0  ;;  %v327_v53 = vadd.f32 0.0001, %v453_v44 }
 0x22b   :  { %308 = vadd.xlane.f32.xlu0 %v307_v45 }
 0x22c   :  { %v328_v59 = vsel %vm326_vm8, %v327_v53, 0.0 }
 0x22d   :  { %v329_v61 = vsel %vm653_vm4, %v290_v35, %v328_v59 }
 0x29e   :  { %v309_v46 = vpop.xlane.xlu0 %308 }
 0x29f   :  { %454 = vrcp.f32 %v309_v46  ;;  %v321_v50 = vand.u32 2147483648, %v309_v46  ;;  %v319_v52 = vand.u32 2147483647, %v309_v46  ;;  %vm315_vm6 = vweird.f32 %v309_v46 }
 0x2a1   :  { %v322_v55 = vor.u32 1.1754944e-38, %v321_v50  ;;  %vm320_vm9 = vcmp.eq.f32.partialorder %v319_v52, 8.507059e+37 }
 0x2a5   :  { %v455_v47 = vpop.eup %454 }
 0x2a6   :  { %v311_v48 = vmul.f32 %v455_v47, %v309_v46  ;;  %vm316_vm5 = vweird.f32 %v455_v47 }
 0x2a7   :  { %vm317_vm7 = vmor %vm315_vm6, %vm316_vm5 }
 0x2a8   :  { %v312_v49 = vsub.f32 1.0, %v311_v48 }
 0x2aa   :  { %v313_v51 = vmul.f32 %v455_v47, %v312_v49 }
 0x2ac   :  { %v314_v54 = vadd.f32 %v455_v47, %v313_v51 }
 0x2ae   :  { %v318_v56 = vsel %vm317_vm7, %v455_v47, %v314_v54 }
 0x2af   :  { %v323_v57 = vsel %vm320_vm9, %v322_v55, %v318_v56 }
 0x2b0   :  { %v324_v58 = vmul.f32 %v323_v57, %v307_v45 }
 0x2b2   :  { %v325_v60 = vadd.f32 0.0001, %v324_v58 }
 0x2b4   :  { %v330_v62 = vsel %vm295_vm1, %v325_v60, %v329_v61 }
 0x2b5   :  { %331 = vst [vmem:[#allocation10] sm:$0xff] %v330_v62 }
 0x2b6   :  { %342 = dma.vmem_to_hbm [thread:$0]  %s338_s6, 128, %s340_s26, [#allocation4]  }
 0x2b7   :  { %582 = dma.done.wait [#allocation4], 128  }
 0x2b8   :  { %583 = vsyncadd [#allocation4], 4294967168 }
 0x2b9   :  { %347 = vsyncpa [#allocation3], 1 }
 0x2ba   :  { %348 = vsyncpa [#allocation6], 1 }
 0x2bb   :  { %349 = vsyncpa [#allocation9], 1 }
 0x2bc   :  { %350 = vsyncpa [#allocation4], 1 }

</bundles_post_ra>
